<compile_context>
chip_gen: v5e
topology: v5e:2x2
jax: 0.10.0
libtpu: 0.0.40
codegen_flags: <defaults>
</compile_context>

<pallas_src>
import functools

import jax
import jax.numpy as jnp
from jax import lax
from jax.experimental import pallas as pl
from jax.experimental.pallas import tpu as pltpu

_MIB = 1024 * 1024


# ----------------------------- kernel helpers -----------------------------

def _layernorm(v, w, b, eps=1e-5):
    # v: (T, C) f32, w/b: (1, C) f32 (adaLN modulation already folded in)
    mu = jnp.mean(v, axis=-1, keepdims=True)
    var = jnp.mean((v - mu) ** 2, axis=-1, keepdims=True)
    return (v - mu) * lax.rsqrt(var + eps) * w + b


def _gelu_exact(v):
    # Exact (erf-based) GELU, matching PyTorch nn.GELU default.  erf is
    # evaluated with the Abramowitz-Stegun 7.1.26 rational approximation
    # (|err| < 1.5e-7): only exp + elementwise ops, so it lowers on all TPU
    # generations and keeps the long polynomial off the VPU crit path.
    x = v * 0.7071067811865476
    ax = jnp.abs(x)
    t = 1.0 / (1.0 + 0.3275911 * ax)
    poly = t * (0.254829592 + t * (-0.284496736 + t * (1.421413741
               + t * (-1.453152027 + t * 1.061405429))))
    erf_ax = 1.0 - poly * jnp.exp(-ax * ax)
    erf_x = jnp.where(x >= 0.0, erf_ax, -erf_ax)
    return 0.5 * v * (1.0 + erf_x)


def _weight_spec(shape, index_map, single_buffer):
    # Constant-index weights: single-buffer (pl.Buffered(1)) so they sit once
    # in VMEM instead of twice (matters most on v7x's 64 MiB / TC).
    if single_buffer:
        return pl.BlockSpec(shape, index_map, pipeline_mode=pl.Buffered(1))
    return pl.BlockSpec(shape, index_map)


def _vmem_limit_bytes():
    # Generation-aware VMEM budget: ~75% of physical per-TC VMEM
    # (v5e/v6e -> 96 MiB, v7x -> 48 MiB), leaving headroom for compiler scratch.
    try:
        cap = pltpu.get_tpu_info().vmem_capacity_bytes
    except Exception:
        cap = 128 * _MIB
    return int(cap) * 3 // 4


def _pick_tile(n, big_vmem):
    cands = (256, 128) if big_vmem else (128,)
    for t in cands:
        if n % t == 0:
            return t
    return n  # small-shape fallback (block == full extent)


# -------------------- kernel A: modulated-LN1 + QKV proj --------------------

def _qkv_kernel(x_ref, ln1s_ref, ln1b_ref, w_qkv_ref, q_ref, k_ref, v_ref):
    C = x_ref.shape[2]
    xm = _layernorm(x_ref[0], ln1s_ref[0], ln1b_ref[0]).astype(jnp.bfloat16)
    # One lane-dense (T, C) @ (C, 3C) matmul; attention scale pre-folded into
    # the Q columns; f32 accumulation.
    qkv = jnp.dot(xm, w_qkv_ref[...], preferred_element_type=jnp.float32)
    q_ref[0] = qkv[:, :C].astype(jnp.bfloat16)
    k_ref[0] = qkv[:, C:2 * C].astype(jnp.bfloat16)
    v_ref[0] = qkv[:, 2 * C:].astype(jnp.bfloat16)


# ------------- kernel B: flash attention + proj + residual + MLP ------------

def _attn_mlp_kernel(x_ref, q_ref, k_ref, v_ref,
                     gate1_ref, ln2s_ref, ln2b_ref, gate2_ref,
                     w_proj_ref, b_proj_ref,
                     w_fc1_ref, b_fc1_ref, w_fc2_ref, b_fc2_ref,
                     out_ref,
                     m_scr, l_scr, acc_scr, ctx_scr,
                     *, num_heads, head_dim):
    H, hd = num_heads, head_dim
    ki = pl.program_id(2)
    nk = pl.num_programs(2)

    @pl.when(ki == 0)
    def _init():
        m_scr[...] = jnp.full(m_scr.shape, -jnp.inf, dtype=jnp.float32)
        l_scr[...] = jnp.zeros(l_scr.shape, dtype=jnp.float32)
        acc_scr[...] = jnp.zeros(acc_scr.shape, dtype=jnp.float32)

    # --- online-softmax update for this kv tile; heads fully unrolled ---
    for h in range(H):
        sl = slice(h * hd, (h + 1) * hd)
        qh = q_ref[0, :, sl]                                  # (tq, hd) bf16
        kh = k_ref[0, :, sl]                                  # (tk, hd) bf16
        vh = v_ref[0, :, sl]                                  # (tk, hd) bf16
        # scores: contract last dims (no explicit transpose), f32 accumulation
        s = lax.dot_general(qh, kh, (((1,), (1,)), ((), ())),
                            preferred_element_type=jnp.float32)   # (tq, tk)
        m_prev = m_scr[h]                                     # (tq, 1)
        m_new = jnp.maximum(m_prev, jnp.max(s, axis=-1, keepdims=True))
        alpha = jnp.exp(m_prev - m_new)
        p = jnp.exp(s - m_new)                                # (tq, tk) f32
        l_scr[h] = alpha * l_scr[h] + jnp.sum(p, axis=-1, keepdims=True)
        acc_scr[h] = alpha * acc_scr[h] + jnp.dot(
            p.astype(jnp.bfloat16), vh, preferred_element_type=jnp.float32)
        m_scr[h] = m_new

    # --- last kv step: finalize attention, out-proj, residual, MLP ---
    @pl.when(ki == nk - 1)
    def _finalize():
        # Normalize each head into lane slices of a single (tq, C) bf16 buffer
        # then one full-depth (tq, C) @ (C, C) output projection.
        for h in range(H):
            inv_l = pl.reciprocal(l_scr[h], approx=True)      # EUP reciprocal
            ctx_scr[:, h * hd:(h + 1) * hd] = (acc_scr[h] * inv_l).astype(jnp.bfloat16)
        attn = jnp.dot(ctx_scr[...], w_proj_ref[...],
                       preferred_element_type=jnp.float32) + b_proj_ref[...]

        x1 = x_ref[0] + gate1_ref[0] * attn                   # gated residual 1

        xm2 = _layernorm(x1, ln2s_ref[0], ln2b_ref[0]).astype(jnp.bfloat16)
        h1 = jnp.dot(xm2, w_fc1_ref[...],
                     preferred_element_type=jnp.float32) + b_fc1_ref[...]
        h1 = _gelu_exact(h1)
        mlp = jnp.dot(h1.astype(jnp.bfloat16), w_fc2_ref[...],
                      preferred_element_type=jnp.float32) + b_fc2_ref[...]

        out_ref[0] = (x1 + gate2_ref[0] * mlp).astype(out_ref.dtype)


# --------------------------------- wrapper ----------------------------------

def prepare_params(params, *, num_heads):
    """One-time weight cast/fold (hoisted out of the per-call path)."""
    C = params["w_qkv"].shape[0]
    hd = C // num_heads
    f32, bf16 = jnp.float32, jnp.bfloat16
    qk_scale = jnp.concatenate(
        [jnp.full((1, C), hd ** -0.5, f32), jnp.ones((1, 2 * C), f32)], axis=-1)
    p = dict(params)
    p["w_qkv_bf16"] = (params["w_qkv"].astype(f32) * qk_scale).astype(bf16)
    p["w_proj_bf16"] = params["w_proj"].astype(bf16)
    p["w_fc1_bf16"] = params["w_fc1"].astype(bf16)
    p["w_fc2_bf16"] = params["w_fc2"].astype(bf16)
    return p


def _block_forward_impl(x, c, params, *, num_heads, q_tile, kv_tile,
                        single_buffer_weights):
    B, N, C = x.shape
    H = num_heads
    assert C % H == 0
    hd = C // H
    Hm = params["w_fc1"].shape[1]
    f32, bf16 = jnp.float32, jnp.bfloat16

    vmem_limit = _vmem_limit_bytes()
    big_vmem = vmem_limit >= 80 * _MIB          # v5e/v6e: yes, v7x: no
    tq = q_tile or _pick_tile(N, big_vmem)
    tk = kv_tile or _pick_tile(N, big_vmem)
    assert N % tq == 0 and N % tk == 0
    n_q, n_k = N // tq, N // tk

    # ---- host-side adaLN (an M=1 matmul would waste the MXU in-kernel) ----
    ada = jax.nn.silu(c.astype(f32)) @ params["w_ada"] + params["b_ada"]   # (B,1,6C)
    shift_msa, scale_msa, gate_msa, shift_mlp, scale_mlp, gate_mlp = \
        jnp.split(ada, 6, axis=-1)
    # Fold the adaLN modulation into the LayerNorm affine parameters.
    ln1_scale = params["ln1_w"] * (1.0 + scale_msa)
    ln1_shift = params["ln1_b"] * (1.0 + scale_msa) + shift_msa
    ln2_scale = params["ln2_w"] * (1.0 + scale_mlp)
    ln2_shift = params["ln2_b"] * (1.0 + scale_mlp) + shift_mlp

    # bf16 weights (from prepare_params when available).
    if "w_qkv_bf16" in params:
        w_qkv, w_proj = params["w_qkv_bf16"], params["w_proj_bf16"]
        w_fc1, w_fc2 = params["w_fc1_bf16"], params["w_fc2_bf16"]
    else:
        pp = prepare_params(params, num_heads=H)
        w_qkv, w_proj, w_fc1, w_fc2 = (pp["w_qkv_bf16"], pp["w_proj_bf16"],
                                       pp["w_fc1_bf16"], pp["w_fc2_bf16"])

    # ----------------- kernel A: modulated-LN1 + QKV projection -------------
    ta = max(tq, tk)
    q, k, v = pl.pallas_call(
        _qkv_kernel,
        out_shape=(jax.ShapeDtypeStruct((B, N, C), bf16),) * 3,
        grid=(B, N // ta),
        in_specs=[
            pl.BlockSpec((1, ta, C), lambda b, ti: (b, ti, 0)),
            pl.BlockSpec((1, 1, C), lambda b, ti: (b, 0, 0)),
            pl.BlockSpec((1, 1, C), lambda b, ti: (b, 0, 0)),
            _weight_spec((C, 3 * C), lambda b, ti: (0, 0), single_buffer_weights),
        ],
        out_specs=(pl.BlockSpec((1, ta, C), lambda b, ti: (b, ti, 0)),) * 3,
        compiler_params=pltpu.CompilerParams(
            dimension_semantics=("parallel", "parallel"),
            vmem_limit_bytes=vmem_limit),
    )(x, ln1_scale, ln1_shift, w_qkv)

    # --------------- kernel B: flash attention + proj + MLP -----------------
    kernel_b = functools.partial(_attn_mlp_kernel, num_heads=H, head_dim=hd)

    def bvec():
        return pl.BlockSpec((1, 1, C), lambda b, qi, ki: (b, 0, 0))

    in_specs = [
        pl.BlockSpec((1, tq, C), lambda b, qi, ki: (b, qi, 0)),   # x (residual)
        pl.BlockSpec((1, tq, C), lambda b, qi, ki: (b, qi, 0)),   # Q (scaled, bf16)
        pl.BlockSpec((1, tk, C), lambda b, qi, ki: (b, ki, 0)),   # K (bf16)
        pl.BlockSpec((1, tk, C), lambda b, qi, ki: (b, ki, 0)),   # V (bf16)
        bvec(), bvec(), bvec(), bvec(),                           # gate1, ln2 s/b, gate2
        _weight_spec((C, C), lambda b, qi, ki: (0, 0), single_buffer_weights),   # w_proj
        _weight_spec((1, C), lambda b, qi, ki: (0, 0), single_buffer_weights),   # b_proj
        _weight_spec((C, Hm), lambda b, qi, ki: (0, 0), single_buffer_weights),  # w_fc1
        _weight_spec((1, Hm), lambda b, qi, ki: (0, 0), single_buffer_weights),  # b_fc1
        _weight_spec((Hm, C), lambda b, qi, ki: (0, 0), single_buffer_weights),  # w_fc2
        _weight_spec((1, C), lambda b, qi, ki: (0, 0), single_buffer_weights),   # b_fc2
    ]

    return pl.pallas_call(
        kernel_b,
        out_shape=jax.ShapeDtypeStruct((B, N, C), x.dtype),
        grid=(B, n_q, n_k),
        in_specs=in_specs,
        out_specs=pl.BlockSpec((1, tq, C), lambda b, qi, ki: (b, qi, 0)),
        scratch_shapes=[
            pltpu.VMEM((H, tq, 1), jnp.float32),    # running max (per head)
            pltpu.VMEM((H, tq, 1), jnp.float32),    # running denom (per head)
            pltpu.VMEM((H, tq, hd), jnp.float32),   # unnormalized context
            pltpu.VMEM((tq, C), jnp.bfloat16),      # normalized context (lane-dense)
        ],
        compiler_params=pltpu.CompilerParams(
            dimension_semantics=("parallel", "parallel", "arbitrary"),
            vmem_limit_bytes=vmem_limit),
    )(x, q, k, v,
      gate_msa, ln2_scale, ln2_shift, gate_mlp,
      w_proj, params["b_proj"],
      w_fc1, params["b_fc1"], w_fc2, params["b_fc2"])


def block_forward(x, c, params, *, num_heads, q_tile=None, kv_tile=None):
    """x: (B, N, C), c: (B, 1, C). Returns (B, N, C)."""
    try:
        return _block_forward_impl(x, c, params, num_heads=num_heads,
                                   q_tile=q_tile, kv_tile=kv_tile,
                                   single_buffer_weights=True)
    except Exception:
        # Fallback for jax versions without BlockSpec(pipeline_mode=pl.Buffered(1)).
        return _block_forward_impl(x, c, params, num_heads=num_heads,
                                   q_tile=q_tile, kv_tile=kv_tile,
                                   single_buffer_weights=False)


# --------------------------- pure-JAX reference -----------------------------

def block_reference(x, c, params, *, num_heads):
    B, N, C = x.shape
    hd = C // num_heads

    def ln(v, w, b, eps=1e-5):
        mu = jnp.mean(v, axis=-1, keepdims=True)
        var = jnp.mean((v - mu) ** 2, axis=-1, keepdims=True)
        return (v - mu) / jnp.sqrt(var + eps) * w + b

    silu = lambda v: v * jax.nn.sigmoid(v)
    gelu = lambda v: 0.5 * v * (1.0 + lax.erf(v / jnp.sqrt(2.0)))

    ada = silu(c) @ params["w_ada"] + params["b_ada"]           # (B, 1, 6C)
    s_msa, sc_msa, g_msa, s_mlp, sc_mlp, g_mlp = jnp.split(ada, 6, axis=-1)

    xm = ln(x, params["ln1_w"], params["ln1_b"]) * (1 + sc_msa) + s_msa
    qkv = xm @ params["w_qkv"]                                  # (B, N, 3C)
    q, k, v = jnp.split(qkv, 3, axis=-1)
    q = q.reshape(B, N, num_heads, hd).transpose(0, 2, 1, 3)
    k = k.reshape(B, N, num_heads, hd).transpose(0, 2, 1, 3)
    v = v.reshape(B, N, num_heads, hd).transpose(0, 2, 1, 3)
    s = jnp.einsum("bhqd,bhkd->bhqk", q, k) * (hd ** -0.5)
    p = jax.nn.softmax(s, axis=-1)
    o = jnp.einsum("bhqk,bhkd->bhqd", p, v).transpose(0, 2, 1, 3).reshape(B, N, C)
    attn = o @ params["w_proj"] + params["b_proj"]

    x1 = x + g_msa * attn

    xm2 = ln(x1, params["ln2_w"], params["ln2_b"]) * (1 + sc_mlp) + s_mlp
    h1 = gelu(xm2 @ params["w_fc1"] + params["b_fc1"])
    mlp = h1 @ params["w_fc2"] + params["b_fc2"]
    return x1 + g_mlp * mlp


# ----------------------------------- main -----------------------------------

if __name__ == "__main__":
    B, N, C = 2, 8, 32
    num_heads = 4
    mlp_ratio = 4.0
    Hm = int(C * mlp_ratio)

    key = jax.random.PRNGKey(0)
    ks = jax.random.split(key, 16)
    init = lambda k, shape, s=0.02: (s * jax.random.normal(k, shape)).astype(jnp.float32)

    params = {
        # adaLN_modulation Linear(dim, 6*dim, bias=True)
        "w_ada":  init(ks[0], (C, 6 * C)),
        "b_ada":  init(ks[1], (1, 6 * C)),
        # norm1 / norm2 affine params
        "ln1_w":  jnp.ones((1, C), jnp.float32) + init(ks[2], (1, C)),
        "ln1_b":  init(ks[3], (1, C)),
        "ln2_w":  jnp.ones((1, C), jnp.float32) + init(ks[4], (1, C)),
        "ln2_b":  init(ks[5], (1, C)),
        # attention: qkv (no bias, qkv_bias=False default), proj (with bias)
        "w_qkv":  init(ks[6], (C, 3 * C)),
        "w_proj": init(ks[7], (C, C)),
        "b_proj": init(ks[8], (1, C)),
        # MLP: fc1, fc2 with bias
        "w_fc1":  init(ks[9], (C, Hm)),
        "b_fc1":  init(ks[10], (1, Hm)),
        "w_fc2":  init(ks[11], (Hm, C)),
        "b_fc2":  init(ks[12], (1, C)),
    }

    x = jax.random.normal(ks[13], (B, N, C), dtype=jnp.float32)
    c = jax.random.normal(ks[14], (B, 1, C), dtype=jnp.float32)

    # One-time weight cast/fold (kept out of the per-step path).
    prepared = prepare_params(params, num_heads=num_heads)

    out = block_forward(x, c, prepared, num_heads=num_heads)
    out = jax.block_until_ready(out)

    ref = block_reference(x, c, params, num_heads=num_heads)
    assert out.shape == (B, N, C)
    # bf16 matmuls + approx reciprocal slightly loosen tolerance vs the f32 ref
    assert jnp.allclose(out, ref, rtol=2e-3, atol=2e-3), \
        f"max abs err {jnp.max(jnp.abs(out - ref))}"

    print("KERNEL_OK")
</pallas_src>

<mosaic_0001>
module attributes {stable_mosaic.version = 11 : i64} {
  func.func @_qkv_kernel(%arg0: i32, %arg1: i32, %arg2: memref<1x8x32xf32, #tpu.memory_space<vmem>>, %arg3: memref<1x1x32xf32, #tpu.memory_space<vmem>>, %arg4: memref<1x1x32xf32, #tpu.memory_space<vmem>>, %arg5: memref<32x96xbf16, #tpu.memory_space<vmem>>, %arg6: memref<1x8x32xbf16, #tpu.memory_space<vmem>>, %arg7: memref<1x8x32xbf16, #tpu.memory_space<vmem>>, %arg8: memref<1x8x32xbf16, #tpu.memory_space<vmem>>) attributes {dimension_semantics = [#tpu.dimension_semantics<parallel>, #tpu.dimension_semantics<parallel>], iteration_bounds = array<i64: 2, 1>, scalar_prefetch = 0 : i64, scratch_operands = 0 : i64, tpu.core_type = #tpu.core_type<tc>, window_params = [{transform_indices = @transform_0, window_bounds = array<i64: 1, 8, 32>}, {transform_indices = @transform_1, window_bounds = array<i64: 1, 1, 32>}, {transform_indices = @transform_2, window_bounds = array<i64: 1, 1, 32>}, {pipeline_mode = #tpu.pipeline_mode<synchronous>, transform_indices = @transform_3, window_bounds = array<i64: 32, 96>}, {transform_indices = @transform_4, window_bounds = array<i64: 1, 8, 32>}, {transform_indices = @transform_5, window_bounds = array<i64: 1, 8, 32>}, {transform_indices = @transform_6, window_bounds = array<i64: 1, 8, 32>}]} {
    %c0 = arith.constant 0 : index
    %c0_0 = arith.constant 0 : index
    %c0_1 = arith.constant 0 : index
    %0 = vector.load %arg2[%c0, %c0_0, %c0_1] : memref<1x8x32xf32, #tpu.memory_space<vmem>>, vector<1x8x32xf32>
    %1 = vector.shape_cast %0 : vector<1x8x32xf32> to vector<8x32xf32>
    %c0_2 = arith.constant 0 : index
    %c0_3 = arith.constant 0 : index
    %c0_4 = arith.constant 0 : index
    %2 = vector.load %arg3[%c0_2, %c0_3, %c0_4] : memref<1x1x32xf32, #tpu.memory_space<vmem>>, vector<1x1x32xf32>
    %3 = vector.shape_cast %2 : vector<1x1x32xf32> to vector<1x32xf32>
    %c0_5 = arith.constant 0 : index
    %c0_6 = arith.constant 0 : index
    %c0_7 = arith.constant 0 : index
    %4 = vector.load %arg4[%c0_5, %c0_6, %c0_7] : memref<1x1x32xf32, #tpu.memory_space<vmem>>, vector<1x1x32xf32>
    %5 = vector.shape_cast %4 : vector<1x1x32xf32> to vector<1x32xf32>
    %cst = arith.constant dense<0.000000e+00> : vector<8xf32>
    %6 = vector.multi_reduction <add>, %1, %cst [1] : vector<8x32xf32> to vector<8xf32>
    %7 = vector.shape_cast %6 : vector<8xf32> to vector<8x1xf32>
    %cst_8 = arith.constant 3.200000e+01 : f32
    %8 = vector.broadcast %cst_8 : f32 to vector<8x1xf32>
    %9 = arith.divf %7, %8 : vector<8x1xf32>
    %10 = vector.broadcast %9 : vector<8x1xf32> to vector<8x32xf32>
    %11 = arith.subf %1, %10 : vector<8x32xf32>
    %12 = arith.mulf %11, %11 : vector<8x32xf32>
    %cst_9 = arith.constant dense<0.000000e+00> : vector<8xf32>
    %13 = vector.multi_reduction <add>, %12, %cst_9 [1] : vector<8x32xf32> to vector<8xf32>
    %14 = vector.shape_cast %13 : vector<8xf32> to vector<8x1xf32>
    %cst_10 = arith.constant 3.200000e+01 : f32
    %15 = vector.broadcast %cst_10 : f32 to vector<8x1xf32>
    %16 = arith.divf %14, %15 : vector<8x1xf32>
    %17 = vector.broadcast %9 : vector<8x1xf32> to vector<8x32xf32>
    %18 = arith.subf %1, %17 : vector<8x32xf32>
    %cst_11 = arith.constant 9.99999974E-6 : f32
    %19 = vector.broadcast %cst_11 : f32 to vector<8x1xf32>
    %20 = arith.addf %16, %19 : vector<8x1xf32>
    %21 = math.rsqrt %20 : vector<8x1xf32>
    %22 = vector.broadcast %21 : vector<8x1xf32> to vector<8x32xf32>
    %23 = arith.mulf %18, %22 : vector<8x32xf32>
    %24 = vector.broadcast %3 : vector<1x32xf32> to vector<8x32xf32>
    %25 = arith.mulf %23, %24 : vector<8x32xf32>
    %26 = vector.broadcast %5 : vector<1x32xf32> to vector<8x32xf32>
    %27 = arith.addf %25, %26 : vector<8x32xf32>
    %28 = arith.truncf %27 : vector<8x32xf32> to vector<8x32xbf16>
    %c0_12 = arith.constant 0 : index
    %c0_13 = arith.constant 0 : index
    %29 = vector.load %arg5[%c0_12, %c0_13] : memref<32x96xbf16, #tpu.memory_space<vmem>>, vector<32x96xbf16>
    %cst_14 = arith.constant dense<0.000000e+00> : vector<8x96xf32>
    %30 = tpu.matmul %28, %29, %cst_14 {dimension_numbers = #tpu.dot_dimension_numbers<[1], [0], [0], [1], [0, 0, 1, 1], [], []>} : vector<8x32xbf16>, vector<32x96xbf16>, vector<8x96xf32> -> vector<8x96xf32>
    %31 = vector.extract_strided_slice %30 {offsets = [0, 0], sizes = [8, 32], strides = [1, 1]} : vector<8x96xf32> to vector<8x32xf32>
    %32 = arith.truncf %31 : vector<8x32xf32> to vector<8x32xbf16>
    %c0_15 = arith.constant 0 : index
    %c0_16 = arith.constant 0 : index
    %c0_17 = arith.constant 0 : index
    %33 = vector.load %arg6[%c0_15, %c0_16, %c0_17] : memref<1x8x32xbf16, #tpu.memory_space<vmem>>, vector<1x8x32xbf16>
    %34 = vector.shape_cast %33 : vector<1x8x32xbf16> to vector<8x32xbf16>
    %35 = vector.shape_cast %32 : vector<8x32xbf16> to vector<1x8x32xbf16>
    tpu.vector_store %arg6[%c0_15, %c0_16, %c0_17], %35 {strides = array<i32>} : memref<1x8x32xbf16, #tpu.memory_space<vmem>>, vector<1x8x32xbf16>,
    %36 = vector.extract_strided_slice %30 {offsets = [0, 32], sizes = [8, 32], strides = [1, 1]} : vector<8x96xf32> to vector<8x32xf32>
    %37 = arith.truncf %36 : vector<8x32xf32> to vector<8x32xbf16>
    %c0_18 = arith.constant 0 : index
    %c0_19 = arith.constant 0 : index
    %c0_20 = arith.constant 0 : index
    %38 = vector.load %arg7[%c0_18, %c0_19, %c0_20] : memref<1x8x32xbf16, #tpu.memory_space<vmem>>, vector<1x8x32xbf16>
    %39 = vector.shape_cast %38 : vector<1x8x32xbf16> to vector<8x32xbf16>
    %40 = vector.shape_cast %37 : vector<8x32xbf16> to vector<1x8x32xbf16>
    tpu.vector_store %arg7[%c0_18, %c0_19, %c0_20], %40 {strides = array<i32>} : memref<1x8x32xbf16, #tpu.memory_space<vmem>>, vector<1x8x32xbf16>,
    %41 = vector.extract_strided_slice %30 {offsets = [0, 64], sizes = [8, 32], strides = [1, 1]} : vector<8x96xf32> to vector<8x32xf32>
    %42 = arith.truncf %41 : vector<8x32xf32> to vector<8x32xbf16>
    %c0_21 = arith.constant 0 : index
    %c0_22 = arith.constant 0 : index
    %c0_23 = arith.constant 0 : index
    %43 = vector.load %arg8[%c0_21, %c0_22, %c0_23] : memref<1x8x32xbf16, #tpu.memory_space<vmem>>, vector<1x8x32xbf16>
    %44 = vector.shape_cast %43 : vector<1x8x32xbf16> to vector<8x32xbf16>
    %45 = vector.shape_cast %42 : vector<8x32xbf16> to vector<1x8x32xbf16>
    tpu.vector_store %arg8[%c0_21, %c0_22, %c0_23], %45 {strides = array<i32>} : memref<1x8x32xbf16, #tpu.memory_space<vmem>>, vector<1x8x32xbf16>,
    return
  }
  func.func @transform_0(%arg0: i32, %arg1: i32) -> (i32, i32, i32) {
    %c0_i32 = arith.constant 0 : i32
    %c0_i32_0 = arith.constant 0 : i32
    return %arg0, %arg1, %c0_i32 : i32, i32, i32
  }
  func.func @transform_1(%arg0: i32, %arg1: i32) -> (i32, i32, i32) {
    %c0_i32 = arith.constant 0 : i32
    %c0_i32_0 = arith.constant 0 : i32
    %c0_i32_1 = arith.constant 0 : i32
    return %arg0, %c0_i32, %c0_i32_0 : i32, i32, i32
  }
  func.func @transform_2(%arg0: i32, %arg1: i32) -> (i32, i32, i32) {
    %c0_i32 = arith.constant 0 : i32
    %c0_i32_0 = arith.constant 0 : i32
    %c0_i32_1 = arith.constant 0 : i32
    return %arg0, %c0_i32, %c0_i32_0 : i32, i32, i32
  }
  func.func @transform_3(%arg0: i32, %arg1: i32) -> (i32, i32) {
    %c0_i32 = arith.constant 0 : i32
    %c0_i32_0 = arith.constant 0 : i32
    %c0_i32_1 = arith.constant 0 : i32
    return %c0_i32, %c0_i32_0 : i32, i32
  }
  func.func @transform_4(%arg0: i32, %arg1: i32) -> (i32, i32, i32) {
    %c0_i32 = arith.constant 0 : i32
    %c0_i32_0 = arith.constant 0 : i32
    return %arg0, %arg1, %c0_i32 : i32, i32, i32
  }
  func.func @transform_5(%arg0: i32, %arg1: i32) -> (i32, i32, i32) {
    %c0_i32 = arith.constant 0 : i32
    %c0_i32_0 = arith.constant 0 : i32
    return %arg0, %arg1, %c0_i32 : i32, i32, i32
  }
  func.func @transform_6(%arg0: i32, %arg1: i32) -> (i32, i32, i32) {
    %c0_i32 = arith.constant 0 : i32
    %c0_i32_0 = arith.constant 0 : i32
    return %arg0, %arg1, %c0_i32 : i32, i32, i32
  }
}

module attributes {stable_mosaic.version = 11 : i64} {
  func.func @_qkv_kernel(%arg0: i32, %arg1: i32, %arg2: memref<1x8x32xf32, #tpu.memory_space<vmem>>, %arg3: memref<1x1x32xf32, #tpu.memory_space<vmem>>, %arg4: memref<1x1x32xf32, #tpu.memory_space<vmem>>, %arg5: memref<32x96xbf16, #tpu.memory_space<vmem>>, %arg6: memref<1x8x32xbf16, #tpu.memory_space<vmem>>, %arg7: memref<1x8x32xbf16, #tpu.memory_space<vmem>>, %arg8: memref<1x8x32xbf16, #tpu.memory_space<vmem>>) attributes {dimension_semantics = [#tpu.dimension_semantics<parallel>, #tpu.dimension_semantics<parallel>], iteration_bounds = array<i64: 2, 1>, scalar_prefetch = 0 : i64, scratch_operands = 0 : i64, tpu.core_type = #tpu.core_type<tc>, window_params = [{transform_indices = @transform_0, window_bounds = array<i64: 1, 8, 32>}, {transform_indices = @transform_1, window_bounds = array<i64: 1, 1, 32>}, {transform_indices = @transform_2, window_bounds = array<i64: 1, 1, 32>}, {pipeline_mode = #tpu.pipeline_mode<synchronous>, transform_indices = @transform_3, window_bounds = array<i64: 32, 96>}, {transform_indices = @transform_4, window_bounds = array<i64: 1, 8, 32>}, {transform_indices = @transform_5, window_bounds = array<i64: 1, 8, 32>}, {transform_indices = @transform_6, window_bounds = array<i64: 1, 8, 32>}]} {
    %c0 = arith.constant 0 : index
    %c0_0 = arith.constant 0 : index
    %c0_1 = arith.constant 0 : index
    %0 = vector.load %arg2[%c0, %c0_0, %c0_1] : memref<1x8x32xf32, #tpu.memory_space<vmem>>, vector<1x8x32xf32>
    %1 = vector.shape_cast %0 : vector<1x8x32xf32> to vector<8x32xf32>
    %c0_2 = arith.constant 0 : index
    %c0_3 = arith.constant 0 : index
    %c0_4 = arith.constant 0 : index
    %2 = vector.load %arg3[%c0_2, %c0_3, %c0_4] : memref<1x1x32xf32, #tpu.memory_space<vmem>>, vector<1x1x32xf32>
    %3 = vector.shape_cast %2 : vector<1x1x32xf32> to vector<1x32xf32>
    %c0_5 = arith.constant 0 : index
    %c0_6 = arith.constant 0 : index
    %c0_7 = arith.constant 0 : index
    %4 = vector.load %arg4[%c0_5, %c0_6, %c0_7] : memref<1x1x32xf32, #tpu.memory_space<vmem>>, vector<1x1x32xf32>
    %5 = vector.shape_cast %4 : vector<1x1x32xf32> to vector<1x32xf32>
    %cst = arith.constant dense<0.000000e+00> : vector<8xf32>
    %6 = vector.multi_reduction <add>, %1, %cst [1] : vector<8x32xf32> to vector<8xf32>
    %7 = vector.shape_cast %6 : vector<8xf32> to vector<8x1xf32>
    %cst_8 = arith.constant 3.200000e+01 : f32
    %8 = vector.broadcast %cst_8 : f32 to vector<8x1xf32>
    %9 = arith.divf %7, %8 : vector<8x1xf32>
    %10 = vector.broadcast %9 : vector<8x1xf32> to vector<8x32xf32>
    %11 = arith.subf %1, %10 : vector<8x32xf32>
    %12 = arith.mulf %11, %11 : vector<8x32xf32>
    %cst_9 = arith.constant dense<0.000000e+00> : vector<8xf32>
    %13 = vector.multi_reduction <add>, %12, %cst_9 [1] : vector<8x32xf32> to vector<8xf32>
    %14 = vector.shape_cast %13 : vector<8xf32> to vector<8x1xf32>
    %cst_10 = arith.constant 3.200000e+01 : f32
    %15 = vector.broadcast %cst_10 : f32 to vector<8x1xf32>
    %16 = arith.divf %14, %15 : vector<8x1xf32>
    %17 = vector.broadcast %9 : vector<8x1xf32> to vector<8x32xf32>
    %18 = arith.subf %1, %17 : vector<8x32xf32>
    %cst_11 = arith.constant 9.99999974E-6 : f32
    %19 = vector.broadcast %cst_11 : f32 to vector<8x1xf32>
    %20 = arith.addf %16, %19 : vector<8x1xf32>
    %21 = math.rsqrt %20 : vector<8x1xf32>
    %22 = vector.broadcast %21 : vector<8x1xf32> to vector<8x32xf32>
    %23 = arith.mulf %18, %22 : vector<8x32xf32>
    %24 = vector.broadcast %3 : vector<1x32xf32> to vector<8x32xf32>
    %25 = arith.mulf %23, %24 : vector<8x32xf32>
    %26 = vector.broadcast %5 : vector<1x32xf32> to vector<8x32xf32>
    %27 = arith.addf %25, %26 : vector<8x32xf32>
    %28 = arith.truncf %27 : vector<8x32xf32> to vector<8x32xbf16>
    %c0_12 = arith.constant 0 : index
    %c0_13 = arith.constant 0 : index
    %29 = vector.load %arg5[%c0_12, %c0_13] : memref<32x96xbf16, #tpu.memory_space<vmem>>, vector<32x96xbf16>
    %cst_14 = arith.constant dense<0.000000e+00> : vector<8x96xf32>
    %30 = tpu.matmul %28, %29, %cst_14 {dimension_numbers = #tpu.dot_dimension_numbers<[1], [0], [0], [1], [0, 0, 1, 1], [], []>} : vector<8x32xbf16>, vector<32x96xbf16>, vector<8x96xf32> -> vector<8x96xf32>
    %31 = vector.extract_strided_slice %30 {offsets = [0, 0], sizes = [8, 32], strides = [1, 1]} : vector<8x96xf32> to vector<8x32xf32>
    %32 = arith.truncf %31 : vector<8x32xf32> to vector<8x32xbf16>
    %c0_15 = arith.constant 0 : index
    %c0_16 = arith.constant 0 : index
    %c0_17 = arith.constant 0 : index
    %33 = vector.load %arg6[%c0_15, %c0_16, %c0_17] : memref<1x8x32xbf16, #tpu.memory_space<vmem>>, vector<1x8x32xbf16>
    %34 = vector.shape_cast %33 : vector<1x8x32xbf16> to vector<8x32xbf16>
    %35 = vector.shape_cast %32 : vector<8x32xbf16> to vector<1x8x32xbf16>
    tpu.vector_store %arg6[%c0_15, %c0_16, %c0_17], %35 {strides = array<i32>} : memref<1x8x32xbf16, #tpu.memory_space<vmem>>, vector<1x8x32xbf16>,
    %36 = vector.extract_strided_slice %30 {offsets = [0, 32], sizes = [8, 32], strides = [1, 1]} : vector<8x96xf32> to vector<8x32xf32>
    %37 = arith.truncf %36 : vector<8x32xf32> to vector<8x32xbf16>
    %c0_18 = arith.constant 0 : index
    %c0_19 = arith.constant 0 : index
    %c0_20 = arith.constant 0 : index
    %38 = vector.load %arg7[%c0_18, %c0_19, %c0_20] : memref<1x8x32xbf16, #tpu.memory_space<vmem>>, vector<1x8x32xbf16>
    %39 = vector.shape_cast %38 : vector<1x8x32xbf16> to vector<8x32xbf16>
    %40 = vector.shape_cast %37 : vector<8x32xbf16> to vector<1x8x32xbf16>
    tpu.vector_store %arg7[%c0_18, %c0_19, %c0_20], %40 {strides = array<i32>} : memref<1x8x32xbf16, #tpu.memory_space<vmem>>, vector<1x8x32xbf16>,
    %41 = vector.extract_strided_slice %30 {offsets = [0, 64], sizes = [8, 32], strides = [1, 1]} : vector<8x96xf32> to vector<8x32xf32>
    %42 = arith.truncf %41 : vector<8x32xf32> to vector<8x32xbf16>
    %c0_21 = arith.constant 0 : index
    %c0_22 = arith.constant 0 : index
    %c0_23 = arith.constant 0 : index
    %43 = vector.load %arg8[%c0_21, %c0_22, %c0_23] : memref<1x8x32xbf16, #tpu.memory_space<vmem>>, vector<1x8x32xbf16>
    %44 = vector.shape_cast %43 : vector<1x8x32xbf16> to vector<8x32xbf16>
    %45 = vector.shape_cast %42 : vector<8x32xbf16> to vector<1x8x32xbf16>
    tpu.vector_store %arg8[%c0_21, %c0_22, %c0_23], %45 {strides = array<i32>} : memref<1x8x32xbf16, #tpu.memory_space<vmem>>, vector<1x8x32xbf16>,
    return
  }
  func.func @transform_0(%arg0: i32, %arg1: i32) -> (i32, i32, i32) {
    %c0_i32 = arith.constant 0 : i32
    %c0_i32_0 = arith.constant 0 : i32
    return %arg0, %arg1, %c0_i32 : i32, i32, i32
  }
  func.func @transform_1(%arg0: i32, %arg1: i32) -> (i32, i32, i32) {
    %c0_i32 = arith.constant 0 : i32
    %c0_i32_0 = arith.constant 0 : i32
    %c0_i32_1 = arith.constant 0 : i32
    return %arg0, %c0_i32, %c0_i32_0 : i32, i32, i32
  }
  func.func @transform_2(%arg0: i32, %arg1: i32) -> (i32, i32, i32) {
    %c0_i32 = arith.constant 0 : i32
    %c0_i32_0 = arith.constant 0 : i32
    %c0_i32_1 = arith.constant 0 : i32
    return %arg0, %c0_i32, %c0_i32_0 : i32, i32, i32
  }
  func.func @transform_3(%arg0: i32, %arg1: i32) -> (i32, i32) {
    %c0_i32 = arith.constant 0 : i32
    %c0_i32_0 = arith.constant 0 : i32
    %c0_i32_1 = arith.constant 0 : i32
    return %c0_i32, %c0_i32_0 : i32, i32
  }
  func.func @transform_4(%arg0: i32, %arg1: i32) -> (i32, i32, i32) {
    %c0_i32 = arith.constant 0 : i32
    %c0_i32_0 = arith.constant 0 : i32
    return %arg0, %arg1, %c0_i32 : i32, i32, i32
  }
  func.func @transform_5(%arg0: i32, %arg1: i32) -> (i32, i32, i32) {
    %c0_i32 = arith.constant 0 : i32
    %c0_i32_0 = arith.constant 0 : i32
    return %arg0, %arg1, %c0_i32 : i32, i32, i32
  }
  func.func @transform_6(%arg0: i32, %arg1: i32) -> (i32, i32, i32) {
    %c0_i32 = arith.constant 0 : i32
    %c0_i32_0 = arith.constant 0 : i32
    return %arg0, %arg1, %c0_i32 : i32, i32, i32
  }
}

</mosaic_0001>

<bundles_post_ra>
// kernel: tpu_custom_call.1
= control target key start
LH: loop header
LB: loop body
LE: loop exit
PB: predicated region body
PF: predicated region fallthrough
CT: control target
= control target key end

     0   :  { %s1413_s0 = inlined_call_operand.hbm [shape: f32[2,8,32], index: 0, kind: input, shape index: {}]   ;;  %s1414_s1 = inlined_call_operand.hbm [shape: f32[2,1,32], index: 1, kind: input, shape index: {}]   ;;  %s1415_s2 = inlined_call_operand.hbm [shape: f32[2,1,32], index: 2, kind: input, shape index: {}]   ;;  %s1416_s3 = inlined_call_operand.hbm [shape: bf16[32,96], index: 3, kind: input, shape index: {}]   ;;  %s1417_s4 = inlined_call_operand.hbm [shape: bf16[2,8,32], index: 4, kind: output, shape index: {0}]   ;;  %s1418_s5 = inlined_call_operand.hbm [shape: bf16[2,8,32], index: 5, kind: output, shape index: {1}]   ;;  %s1419_s6 = inlined_call_operand.hbm [shape: bf16[2,8,32], index: 6, kind: output, shape index: {2}]  }
   0x1   :  { %1431 = sst [smem:[#allocation26_spill]] %s1414_s1 }
   0x2   :  { %1432 = sst [smem:[#allocation27_spill]] %s1416_s3 }
   0x3   :  { %1433 = sst [smem:[#allocation28_spill]] %s1418_s5 }
   0x4   :  { %1434 = sst [smem:[#allocation29_spill]] %s1419_s6 }
   0x5   :  { %12 = vsyncpa [#allocation3], 0 }
   0x6   :  { %14 = vsyncpa [#allocation3 + $0x1], 0 }
   0x7   :  { %15 = vsyncpa [#allocation6], 0 }
   0x8   :  { %17 = vsyncpa [#allocation6 + $0x1], 0 }
   0x9   :  { %18 = vsyncpa [#allocation9], 0 }
   0xa   :  { %19 = vsyncpa [#allocation4], 0 }
   0xb   :  { %21 = vsyncpa [#allocation4 + $0x1], 0 }
   0xc   :  { %22 = vsyncpa [#allocation12], 0 }
   0xd   :  { %24 = vsyncpa [#allocation12 + $0x1], 0  ;;  %s1175_s21 = smov 0   ;;  %s1177_s22 = smov 0  }
   0xe   :  { %s1179_s23 = smov 0   ;;  %s1181_s24 = smov 0  }
   0xf   :  { %s1183_s25 = smov 0   ;;  %s1185_s26 = smov 0  }
  0x10 LB: > { %1435 = sst [smem:[#allocation19_spill]] %s1112_s21  ;;  %s1206_s27 = sadd.s32 4294967295, %s1132_s26   ;;  %s1132_s26 = sphi %s1185_s26, %s30_s26   ;;  %s1128_s25 = sphi %s1183_s25, %s1462_s25   ;;  %s1124_s24 = sphi %s1181_s24, %s1461_s24   ;;  %s1120_s23 = sphi %s1179_s23, %s1457_s23   ;;  %s1116_s22 = sphi %s1177_s22, %s1460_s22   ;;  %s1112_s21 = sphi %s1175_s21, %s1459_s21  }
  0x11   : > { %1436 = sst [smem:[#allocation20_spill]] %s1120_s23  ;;  %s1420_s28 = sadd.s32 4294967294, %s1132_s26  }
  0x12   : > { %1437 = sst [smem:[#allocation21_spill]] %s1132_s26  ;;  %s42_s29 = sadd.s32 1, %s1128_s25 }
  0x13   : > { %s51_s30 = sadd.s32 1, %s1120_s23  ;;  %p44_p0 = scmp.ge.s32.totalorder %s42_s29, 2 }
  0x14   : > { %p58_p1 = scmp.ne.s32.totalorder %s1120_s23, %s1116_s22  ;;  %p59_p2 = scmp.eq.s32.totalorder %s1132_s26, 0 }
  0x15   : > { %p64_p3 = scmp.ne.s32.totalorder %s1116_s22, %s1112_s21  ;;  %s1464_s29 = smov (%p44_p0, %s42_s29), 0 }
  0x16   : > { %1438 = sst [smem:[#allocation22_spill]] %s1464_s29  ;;  %p60_p4 = por %p59_p2, %p58_p1 }
  0x17   : > { %p163_p5 = scmp.eq.s32.totalorder %s1206_s27, 1  ;;  %s46_s7 = ssub.s32 %s1128_s25, %s1464_s29 }
  0x18   : > { %p169_p6 = scmp.eq.s32.totalorder %s1420_s28, 1  ;;  %p49_p7 = scmp.eq.s32.totalorder %s46_s7, 0 }
  0x19   : > { %p1223_p8 = por %p163_p5, %p58_p1  ;;  %p730_p10 = scmp.ge.s32.totalorder %s1132_s26, 2 }
  0x1a   : > { %p1230_p9 = por %p169_p6, %p64_p3  ;;  %p799_p11 = scmp.lt.s32.totalorder %s1132_s26, 2 }
  0x1b   : > { %s1439_s8 = scalar_select %p1223_p8, 1, 0 }
  0x1c   : > { %s1441_s9 = scalar_select %p1230_p9, 1, 0 }
  0x1d   : > { %1440 = sst [smem:[#allocation23_spill]] %s1439_s8  ;;  %s1240_s11 = sand.u32 1, %s1120_s23  }
  0x1e   : > { %1442 = sst [smem:[#allocation24_spill]] %s1441_s9  ;;  %s279_s12 = sand.u32 1, %s1132_s26  }
  0x1f   : > { %s1235_s10 = scalar_select %p49_p7, %s1120_s23, %s51_s30  }
  0x20   : > { %p1243_p12 = pnand %p799_p11, %p60_p4  ;;  %s1445_s1 = sld [smem:[#allocation26_spill]] }
  0x21   : > { %1443 = sst [smem:[#allocation25_spill]] %s1235_s10  ;;  %s282_s18 = scalar_lea.vmem [#allocation5], %s1240_s11 }
  0x22   : > { %s289_s19 = sshll.u32 %s282_s18, 4  ;;  %s1252_s20 = scalar_lea.sflag [#allocation6], %s279_s12  ;;  %s290_s19 = int_to_ptr.vmem [resolvable:$true] %s289_s19 }
  0x23   : > { %p65_p13 = scmp.eq.s32.totalorder %s1206_s27, 0  ;;  %p728_p0 = scmp.ge.s32.totalorder %s1132_s26, 1 }
  0x24   : > { %p232_p1 = scmp.lt.s32.totalorder %s1132_s26, 3  ;;  %s1447_s3 = sld [smem:[#allocation27_spill]] }
  0x25   : > { %p1265_p2 = por %p65_p13, %p64_p3  ;;  %s1134_s12 = smov [#allocation8]  }
  0x26   : > { %s285_s16 = scalar_lea.hbm %s1445_s1, %s1128_s25  ;;  %p1272_p4 = pnand %p728_p0, %p232_p1 }
  0x27   : > { %s287_s17 = sshll.u32 %s285_s16, 4  ;;  %s731_s18 = sshll.u32 %s1240_s11, 3  ;;  %s288_s17 = int_to_ptr.hbm [resolvable:$true] %s287_s17 }
  0x28   : > { %784 = dma.hbm_to_vmem [thread:$0]  (!%p1243_p12), %s288_s17, 16, %s290_s19, %s1252_s20  }
  0x29   : > { %p774_p5 = pneg %p1272_p4  ;;  %s245_s17 = sshll.u32 %s1134_s12, 4  ;;  %s246_s17 = int_to_ptr.vmem [resolvable:$true] %s245_s17 }
  0x2a   : > { %s243_s15 = sshll.u32 %s1447_s3, 4  ;;  %s732_s19 = sshll.u32 %s1128_s25, 3  ;;  %s244_s15 = int_to_ptr.hbm [resolvable:$true] %s243_s15 }
  0x2b   : > { %p775_p3 = pnand %p774_p5, %p65_p13  ;;  %s1135_s7 = smov 64  }
  0x2c   : > { %s1136_s14 = smov 4   ;;  %s268_s3 = scalar_lea.hbm %s1413_s0, %s732_s19 }
  0x2d   : > { %777 = dma.hbm_to_vmem [thread:$0]  (!%p775_p3), %s244_s15, 256, %s246_s17, [#allocation9], %s1135_s7, %s1135_s7, %s1136_s14  }
  0x2e   : > { %s263_s29 = scalar_lea.vmem [#allocation2], %s731_s18  ;;  %s270_s23 = sshll.u32 %s268_s3, 4  ;;  %s271_s23 = int_to_ptr.hbm [resolvable:$true] %s270_s23 }
  0x2f   : > { %s272_s10 = sshll.u32 %s263_s29, 4  ;;  %s260_s12 = scalar_lea.sflag [#allocation3], %s1240_s11  ;;  %s273_s10 = int_to_ptr.vmem [resolvable:$true] %s272_s10 }
  0x30   : > { %781 = dma.hbm_to_vmem [thread:$0]  (!%p1243_p12), %s271_s23, 128, %s273_s10, %s260_s12  }
  0x31   : > { %s302_s21 = scalar_lea.hbm %s1415_s2, %s1128_s25  ;;  %s299_s6 = scalar_lea.vmem [#allocation7], %s1240_s11 }
  0x32   : > { %s306_s5 = sshll.u32 %s299_s6, 4  ;;  %s304_s8 = sshll.u32 %s302_s21, 4  ;;  %s307_s5 = int_to_ptr.vmem [resolvable:$true] %s306_s5  ;;  %s305_s8 = int_to_ptr.hbm [resolvable:$true] %s304_s8 }
  0x33   : > { %787 = dma.hbm_to_vmem [thread:$0]  (!%p1243_p12), %s305_s8, 16, %s307_s5, %s1252_s20  }
  0x34   : > { %315 = sbr.rel (%p1272_p4) target bundleno = 593 (0x251), region = 36  ;;  %s1299_s1 = sand.u32 (!%p1272_p4), 1, %s1116_s22  }
  0x35   : > { %s734_s3 = sshll.u32 (!%p1272_p4), %s1299_s1, 3  ;;  %s318_s23 = scalar_lea.sflag (!%p1272_p4), [#allocation3], %s1299_s1 }
  0x36   : > { %s321_s26 = scalar_lea.vmem (!%p1272_p4), [#allocation2], %s734_s3 }
  0x39   : > { %1091 = dma.done.wait (%p1265_p2), %s318_s23, 128  }
  0x3a   : > { %1093 = vsyncadd (%p1265_p2), %s318_s23, 4294967168  ;;  %s327_s5 = sand.u32 1, %s1206_s27   ;;  %s330_s21 = scalar_lea.vmem [#allocation5], %s1299_s1 }
  0x3b   : > { %s328_s6 = scalar_lea.sflag [#allocation6], %s327_s5 }
  0x3c   : > { %1095 = dma.done.wait (%p1265_p2), %s328_s6, 32  }
  0x3d   : > { %1097 = vsyncadd (%p1265_p2), %s328_s6, 4294967264  ;;  %s339_s28 = scalar_lea.vmem [#allocation7], %s1299_s1 }
  0x3e   : > { %1099 = dma.done.wait (%p65_p13), [#allocation9], 256  }
  0x3f   : > { %1101 = vsyncadd (%p65_p13), [#allocation9], 4294967040  ;;  %vm396_vm0 = vcmask 261120   ;;  %v393_v0 = vld [vmem:[%s321_s26] sm:$0xff]  ;;  %v1137_v2 = vmov 32.0   ;;  %v756_v15 = vld [vmem:[#allocation8] sm:$0xff] }
  0x40   : > { %v397_v1 = vsel %vm396_vm0, %v393_v0, 0.0  ;;  %858 = vrcp.f32 %v1137_v2  ;;  %v757_v14 = vld [vmem:[#allocation8 + $0x8] sm:$0xff]  ;;  %s1328_s29 = sshll.u32 %s1299_s1, 2  ;;  %s1331_s8 = sshll.u32 %s1124_s24, 2  ;;  %vm468_vm5 = vcmask 257024  }
  0x41   : > { %398 = vadd.xlane.f32.xlu0 %v397_v1  ;;  %460 = vmatpush.bf16.msra.mxu0 %v757_v14  ;;  %v856_v25 = vld [vmem:[%s330_s21] ss:$0 sm:$0xff]  ;;  %s501_s11 = scalar_lea.hbm %s1417_s4, %s1331_s8  ;;  %s377_s13 = scalar_lea.vmem [#allocation10], %s1328_s29 }
  0x42   : > { %v857_v28 = vld [vmem:[%s339_s28] ss:$0 sm:$0xff]  ;;  %s503_s30 = sshll.u32 %s377_s13, 4  ;;  %s505_s15 = sshll.u32 %s501_s11, 4  ;;  %s504_s30 = int_to_ptr.vmem [resolvable:$true] %s503_s30  ;;  %s506_s15 = int_to_ptr.hbm [resolvable:$true] %s505_s15 }
  0x43   : > { %s1138_s16 = smov 96   ;;  %s480_s24 = scalar_lea.sflag [#allocation4], %s1299_s1 }
  0x44   : > { %s996_s17 = sshra.s32 %s506_s15, 4  ;;  %s1002_s14 = scalar_lea.hbm %s1417_s4, 8  ;;  %s997_s17 = int_to_ptr.hbm [resolvable:$true] %s996_s17 }
  0x45   : > { %461 = vmatpush.bf16.msra.mxu0 %v756_v15  ;;  %s998_s18 = scalar_lea.hbm %s997_s17, 4  ;;  %p1003_p12 = scmp.lt.s32.totalorder %s997_s17, %s1417_s4 }
  0x46   : > { %v859_v3 = vpop.eup %858  ;;  %p999_p6 = scmp.ne.s32.totalorder %s997_s17, %s998_s18  ;;  %p1004_p13 = scmp.lt.s32.totalorder %s1002_s14, %s998_s18 }
  0x47   : > { %v401_v4 = vmul.f32 32.0, %v859_v3  ;;  %vm405_vm1 = vweird.f32 %v859_v3 }
  0x48   : > { %p1000_p7 = pnand %p999_p6, %p1223_p8  ;;  %p1005_p0 = por %p1004_p13, %p1003_p12 }
  0x49   : > { %v402_v5 = vsub.f32 1.0, %v401_v4 }
  0x4a   : > { %p1001_p11 = pneg %p1000_p7 }
  0x4b   : > { %v403_v6 = vmul.f32 %v859_v3, %v402_v5 }
  0x4c   : > { %p1006_p1 = pnand %p1005_p0, %p1001_p11 }
  0x4d   : > { %v404_v7 = vadd.f32 %v859_v3, %v403_v6 }
  0x4f   : > { %v406_v8 = vsel %vm405_vm1, %v859_v3, %v404_v7 }
  0xb4   : > { %v399_v9 = vpop.xlane.xlu0 %398 }
  0xb5   : > { %v407_v10 = vmul.f32 %v406_v8, %v399_v9 }
  0xb7   : > { %v408_v11 = vsub.f32 %v393_v0, %v407_v10 }
  0xb9   : > { %v409_v12 = vmul.f32 %v408_v11, %v408_v11 }
  0xbb   : > { %v410_v13 = vsel %vm396_vm0, %v409_v12, 0.0 }
  0xbc   : > { %411 = vadd.xlane.f32.xlu0 %v410_v13 }
 0x12f   : > { %v412_v16 = vpop.xlane.xlu0 %411 }
 0x130   : > { %v413_v17 = vmul.f32 %v412_v16, %v406_v8 }
 0x132   : > { %v414_v18 = vadd.f32 1e-05, %v413_v17 }
 0x134   : > { %860 = vrsqrt.f32 %v414_v18  ;;  %vm421_vm3 = vweird.f32 %v414_v18 }
 0x13a   : > { %v861_v19 = vpop.eup %860 }
 0x13b   : > { %v416_v20 = vmul.f32 %v861_v19, %v414_v18  ;;  %vm422_vm2 = vweird.f32 %v861_v19 }
 0x13c   : > { %vm423_vm4 = vmor %vm421_vm3, %vm422_vm2 }
 0x13d   : > { %v417_v21 = vmul.f32 %v861_v19, %v416_v20 }
 0x13f   : > { %v418_v22 = vmul.f32 0.5, %v417_v21 }
 0x141   : > { %v419_v23 = vsub.f32 1.5, %v418_v22 }
 0x143   : > { %v420_v24 = vmul.f32 %v861_v19, %v419_v23 }
 0x145   : > { %v424_v26 = vsel %vm423_vm4, %v861_v19, %v420_v24 }
 0x146   : > { %v425_v27 = vmul.f32 %v424_v26, %v408_v11 }
 0x148   : > { %v429_v29 = vmul.f32 %v856_v25, %v425_v27 }
 0x14a   : > { %v433_v30 = vadd.f32 %v857_v28, %v429_v29 }
 0x14c   : > { %v434_v31 = vpack.c.bf16 %v433_v30, %v433_v30 }
 0x14e   : > { %747 = vmatmul.msk.bf16.vlgmr.msra.gmra.mxu0 %vm396_vm0, %v434_v31 }
 0x1cb   : > { %v463_v32 = vpop.f32.mrf.mxu0 }
 0x1cc   : > { %v467_v33 = vpack.c.bf16 %v463_v32, %v463_v32 }
 0x1ce   : > { %471 = vrot.lane.b32.xlu1 %v467_v33, %s1138_s16  ;;  %469 = vst.msk [vmem:[%s377_s13] sm:$0xf] %vm468_vm5, %v467_v33 }
 0x1cf   : > { %1009 = shalt.err (!%p1006_p1)
}
 0x1d0   : > { %768 = dma.vmem_to_hbm [thread:$0]  (%p1223_p8), %s504_s30, 64, %s506_s15, %s480_s24  }
 0x1d1   : > { %s1139_s1 = smov 64   ;;  %s1450_s6 = sld [smem:[#allocation28_spill]] }
 0x1d2   : > { %s384_s28 = scalar_lea.vmem [#allocation11], %s1328_s29  ;;  %s1451_s16 = sld [smem:[#allocation29_spill]] }
 0x1d3   : > { %v465_v34 = vpop.f32.mrf.mxu0  ;;  %s518_s9 = sshll.u32 %s384_s28, 4  ;;  %s1362_s15 = scalar_lea.sflag [#allocation12], %s327_s5  ;;  %s519_s9 = int_to_ptr.vmem [resolvable:$true] %s518_s9 }
 0x1d6   : > { %475 = vrot.lane.b32.xlu1 %v467_v33, %s1139_s1 }
 0x1d7   : > { %s516_s21 = scalar_lea.hbm %s1450_s6, %s1331_s8  ;;  %s1030_s7 = scalar_lea.hbm %s1450_s6, 8 }
 0x1d8   : > { %s520_s10 = sshll.u32 %s516_s21, 4  ;;  %s531_s30 = scalar_lea.hbm %s1451_s16, %s1331_s8  ;;  %s521_s10 = int_to_ptr.hbm [resolvable:$true] %s520_s10 }
 0x1d9   : > { %s1024_s24 = sshra.s32 %s521_s10, 4  ;;  %s1025_s24 = int_to_ptr.hbm [resolvable:$true] %s1024_s24 }
 0x1da   : > { %s1026_s17 = scalar_lea.hbm %s1025_s24, 4  ;;  %p1031_p3 = scmp.lt.s32.totalorder %s1025_s24, %s1450_s6 }
 0x1db   : > { %p1027_p2 = scmp.ne.s32.totalorder %s1025_s24, %s1026_s17  ;;  %p1032_p6 = scmp.lt.s32.totalorder %s1030_s7, %s1026_s17 }
 0x1dd   : > { %p1028_p4 = pnand %p1027_p2, %p1223_p8  ;;  %p1033_p7 = por %p1032_p6, %p1031_p3 }
 0x1df   : > { %p1029_p5 = pneg %p1028_p4 }
 0x1e1   : > { %p1034_p11 = pnand %p1033_p7, %p1029_p5 }
 0x240   : > { %v472_v35 = vpop.permute.xlu1 %471 }
 0x241   : > { %474 = vst.msk [vmem:[%s384_s28] sm:$0xf] %vm468_vm5, %v472_v35 }
 0x242   : > { %1037 = shalt.err (!%p1034_p11)
}
 0x243   : > { %769 = dma.vmem_to_hbm [thread:$0]  (%p1223_p8), %s519_s9, 64, %s521_s10, %s1362_s15  }
 0x244   : > { %s391_s27 = scalar_lea.vmem [#allocation13], %s1328_s29  ;;  %s535_s8 = sshll.u32 %s531_s30, 4  ;;  %s536_s8 = int_to_ptr.hbm [resolvable:$true] %s535_s8 }
 0x245   : > { %s533_s5 = sshll.u32 %s391_s27, 4  ;;  %s1052_s3 = sshra.s32 %s536_s8, 4  ;;  %s534_s5 = int_to_ptr.vmem [resolvable:$true] %s533_s5  ;;  %s1053_s3 = int_to_ptr.hbm [resolvable:$true] %s1052_s3 }
 0x246   : > { %s1054_s1 = scalar_lea.hbm %s1053_s3, 4  ;;  %s1058_s21 = scalar_lea.hbm %s1451_s16, 8 }
 0x247   : > { %p1055_p12 = scmp.ne.s32.totalorder %s1053_s3, %s1054_s1  ;;  %p1059_p1 = scmp.lt.s32.totalorder %s1053_s3, %s1451_s16 }
 0x248   : > { %v476_v36 = vpop.permute.xlu1 %475  ;;  %p1060_p2 = scmp.lt.s32.totalorder %s1058_s21, %s1054_s1 }
 0x249   : > { %478 = vst.msk [vmem:[%s391_s27] sm:$0xf] %vm468_vm5, %v476_v36  ;;  %p1056_p13 = pnand %p1055_p12, %p1223_p8 }
 0x24a   : > { %p1061_p4 = por %p1060_p2, %p1059_p1 }
 0x24b   : > { %p1057_p0 = pneg %p1056_p13 }
 0x24d   : > { %p1062_p5 = pnand %p1061_p4, %p1057_p0 }
 0x24f   : > { %1065 = shalt.err (!%p1062_p5)
}
 0x250   : > { %770 = dma.vmem_to_hbm [thread:$0]  (%p1223_p8), %s534_s5, 64, %s536_s8, %s1362_s15  }
 0x251 PF: > { %s1452_s9 = sld [smem:[#allocation19_spill]]  ;;  %p789_p3 = pnand %p730_p10, %p1230_p9 }
 0x252   : > { %s1454_s11 = sld [smem:[#allocation21_spill]] }
 0x253   : > { %p790_p6 = pneg %p789_p3 }
 0x257   : > { %s547_s13 = sand.u32 1, %s1452_s9  }
 0x258   : > { %s548_s30 = scalar_lea.sflag [#allocation4], %s547_s13 }
 0x259   : > { %1103 = dma.done.wait (%p790_p6), %s548_s30, 64  }
 0x25a   : > { %1105 = vsyncadd (%p790_p6), %s548_s30, 4294967232  ;;  %s1455_s24 = sadd.s32 4294967294, %s1454_s11  }
 0x25b   : > { %s557_s17 = sand.u32 1, %s1455_s24  }
 0x25c   : > { %s558_s18 = scalar_lea.sflag [#allocation12], %s557_s17 }
 0x25d   : > { %1107 = dma.done.wait (%p790_p6), %s558_s18, 128  }
 0x25e   : > { %1109 = vsyncadd (%p790_p6), %s558_s18, 4294967168  ;;  %s30_s26 = sadd.s32 1, %s1454_s11   ;;  %s1456_s20 = sld [smem:[#allocation20_spill]] }
 0x25f   : > { %p27_p8 = scmp.ge.s32.totalorder %s30_s26, 4   ;;  %s1457_s23 = sld [smem:[#allocation25_spill]] }
 0x260   : > { %s1458_s15 = sld [smem:[#allocation22_spill]]  ;;  %s1459_s21 = smov %s1116_s22 }
 0x261   : > { %s1461_s24 = smov %s1128_s25 }
 0x262   :  { %29 = sbr.rel (!%p27_p8) target bundleno = 16 (0x10), region = 141 }
 0x264   : > { %s1460_s22 = smov %s1456_s20 }
 0x266   : > { %s1462_s25 = smov %s1458_s15 }
 0x267   :  { %574 = vsyncpa [#allocation3], 1 }
 0x268   :  { %576 = vsyncpa [#allocation3 + $0x1], 1 }
 0x269   :  { %577 = vsyncpa [#allocation6], 1 }
 0x26a   :  { %579 = vsyncpa [#allocation6 + $0x1], 1 }
 0x26b   :  { %580 = vsyncpa [#allocation9], 1 }
 0x26c   :  { %581 = vsyncpa [#allocation4], 1 }
 0x26d   :  { %583 = vsyncpa [#allocation4 + $0x1], 1 }
 0x26e   :  { %584 = vsyncpa [#allocation12], 1 }
 0x26f   :  { %586 = vsyncpa [#allocation12 + $0x1], 1 }

// kernel: tpu_custom_call.1
= control target key start
LH: loop header
LB: loop body
LE: loop exit
PB: predicated region body
PF: predicated region fallthrough
CT: control target
= control target key end

     0   :  { %s1413_s0 = inlined_call_operand.hbm [shape: f32[2,8,32], index: 0, kind: input, shape index: {}]   ;;  %s1414_s1 = inlined_call_operand.hbm [shape: f32[2,1,32], index: 1, kind: input, shape index: {}]   ;;  %s1415_s2 = inlined_call_operand.hbm [shape: f32[2,1,32], index: 2, kind: input, shape index: {}]   ;;  %s1416_s3 = inlined_call_operand.hbm [shape: bf16[32,96], index: 3, kind: input, shape index: {}]   ;;  %s1417_s4 = inlined_call_operand.hbm [shape: bf16[2,8,32], index: 4, kind: output, shape index: {0}]   ;;  %s1418_s5 = inlined_call_operand.hbm [shape: bf16[2,8,32], index: 5, kind: output, shape index: {1}]   ;;  %s1419_s6 = inlined_call_operand.hbm [shape: bf16[2,8,32], index: 6, kind: output, shape index: {2}]  }
   0x1   :  { %1431 = sst [smem:[#allocation26_spill]] %s1414_s1 }
   0x2   :  { %1432 = sst [smem:[#allocation27_spill]] %s1416_s3 }
   0x3   :  { %1433 = sst [smem:[#allocation28_spill]] %s1418_s5 }
   0x4   :  { %1434 = sst [smem:[#allocation29_spill]] %s1419_s6 }
   0x5   :  { %12 = vsyncpa [#allocation3], 0 }
   0x6   :  { %14 = vsyncpa [#allocation3 + $0x1], 0 }
   0x7   :  { %15 = vsyncpa [#allocation6], 0 }
   0x8   :  { %17 = vsyncpa [#allocation6 + $0x1], 0 }
   0x9   :  { %18 = vsyncpa [#allocation9], 0 }
   0xa   :  { %19 = vsyncpa [#allocation4], 0 }
   0xb   :  { %21 = vsyncpa [#allocation4 + $0x1], 0 }
   0xc   :  { %22 = vsyncpa [#allocation12], 0 }
   0xd   :  { %24 = vsyncpa [#allocation12 + $0x1], 0  ;;  %s1175_s21 = smov 0   ;;  %s1177_s22 = smov 0  }
   0xe   :  { %s1179_s23 = smov 0   ;;  %s1181_s24 = smov 0  }
   0xf   :  { %s1183_s25 = smov 0   ;;  %s1185_s26 = smov 0  }
  0x10 LB: > { %1435 = sst [smem:[#allocation19_spill]] %s1112_s21  ;;  %s1206_s27 = sadd.s32 4294967295, %s1132_s26   ;;  %s1132_s26 = sphi %s1185_s26, %s30_s26   ;;  %s1128_s25 = sphi %s1183_s25, %s1462_s25   ;;  %s1124_s24 = sphi %s1181_s24, %s1461_s24   ;;  %s1120_s23 = sphi %s1179_s23, %s1457_s23   ;;  %s1116_s22 = sphi %s1177_s22, %s1460_s22   ;;  %s1112_s21 = sphi %s1175_s21, %s1459_s21  }
  0x11   : > { %1436 = sst [smem:[#allocation20_spill]] %s1120_s23  ;;  %s1420_s28 = sadd.s32 4294967294, %s1132_s26  }
  0x12   : > { %1437 = sst [smem:[#allocation21_spill]] %s1132_s26  ;;  %s42_s29 = sadd.s32 1, %s1128_s25 }
  0x13   : > { %s51_s30 = sadd.s32 1, %s1120_s23  ;;  %p44_p0 = scmp.ge.s32.totalorder %s42_s29, 2 }
  0x14   : > { %p58_p1 = scmp.ne.s32.totalorder %s1120_s23, %s1116_s22  ;;  %p59_p2 = scmp.eq.s32.totalorder %s1132_s26, 0 }
  0x15   : > { %p64_p3 = scmp.ne.s32.totalorder %s1116_s22, %s1112_s21  ;;  %s1464_s29 = smov (%p44_p0, %s42_s29), 0 }
  0x16   : > { %1438 = sst [smem:[#allocation22_spill]] %s1464_s29  ;;  %p60_p4 = por %p59_p2, %p58_p1 }
  0x17   : > { %p163_p5 = scmp.eq.s32.totalorder %s1206_s27, 1  ;;  %s46_s7 = ssub.s32 %s1128_s25, %s1464_s29 }
  0x18   : > { %p169_p6 = scmp.eq.s32.totalorder %s1420_s28, 1  ;;  %p49_p7 = scmp.eq.s32.totalorder %s46_s7, 0 }
  0x19   : > { %p1223_p8 = por %p163_p5, %p58_p1  ;;  %p730_p10 = scmp.ge.s32.totalorder %s1132_s26, 2 }
  0x1a   : > { %p1230_p9 = por %p169_p6, %p64_p3  ;;  %p799_p11 = scmp.lt.s32.totalorder %s1132_s26, 2 }
  0x1b   : > { %s1439_s8 = scalar_select %p1223_p8, 1, 0 }
  0x1c   : > { %s1441_s9 = scalar_select %p1230_p9, 1, 0 }
  0x1d   : > { %1440 = sst [smem:[#allocation23_spill]] %s1439_s8  ;;  %s1240_s11 = sand.u32 1, %s1120_s23  }
  0x1e   : > { %1442 = sst [smem:[#allocation24_spill]] %s1441_s9  ;;  %s279_s12 = sand.u32 1, %s1132_s26  }
  0x1f   : > { %s1235_s10 = scalar_select %p49_p7, %s1120_s23, %s51_s30  }
  0x20   : > { %p1243_p12 = pnand %p799_p11, %p60_p4  ;;  %s1445_s1 = sld [smem:[#allocation26_spill]] }
  0x21   : > { %1443 = sst [smem:[#allocation25_spill]] %s1235_s10  ;;  %s282_s18 = scalar_lea.vmem [#allocation5], %s1240_s11 }
  0x22   : > { %s289_s19 = sshll.u32 %s282_s18, 4  ;;  %s1252_s20 = scalar_lea.sflag [#allocation6], %s279_s12  ;;  %s290_s19 = int_to_ptr.vmem [resolvable:$true] %s289_s19 }
  0x23   : > { %p65_p13 = scmp.eq.s32.totalorder %s1206_s27, 0  ;;  %p728_p0 = scmp.ge.s32.totalorder %s1132_s26, 1 }
  0x24   : > { %p232_p1 = scmp.lt.s32.totalorder %s1132_s26, 3  ;;  %s1447_s3 = sld [smem:[#allocation27_spill]] }
  0x25   : > { %p1265_p2 = por %p65_p13, %p64_p3  ;;  %s1134_s12 = smov [#allocation8]  }
  0x26   : > { %s285_s16 = scalar_lea.hbm %s1445_s1, %s1128_s25  ;;  %p1272_p4 = pnand %p728_p0, %p232_p1 }
  0x27   : > { %s287_s17 = sshll.u32 %s285_s16, 4  ;;  %s731_s18 = sshll.u32 %s1240_s11, 3  ;;  %s288_s17 = int_to_ptr.hbm [resolvable:$true] %s287_s17 }
  0x28   : > { %784 = dma.hbm_to_vmem [thread:$0]  (!%p1243_p12), %s288_s17, 16, %s290_s19, %s1252_s20  }
  0x29   : > { %p774_p5 = pneg %p1272_p4  ;;  %s245_s17 = sshll.u32 %s1134_s12, 4  ;;  %s246_s17 = int_to_ptr.vmem [resolvable:$true] %s245_s17 }
  0x2a   : > { %s243_s15 = sshll.u32 %s1447_s3, 4  ;;  %s732_s19 = sshll.u32 %s1128_s25, 3  ;;  %s244_s15 = int_to_ptr.hbm [resolvable:$true] %s243_s15 }
  0x2b   : > { %p775_p3 = pnand %p774_p5, %p65_p13  ;;  %s1135_s7 = smov 64  }
  0x2c   : > { %s1136_s14 = smov 4   ;;  %s268_s3 = scalar_lea.hbm %s1413_s0, %s732_s19 }
  0x2d   : > { %777 = dma.hbm_to_vmem [thread:$0]  (!%p775_p3), %s244_s15, 256, %s246_s17, [#allocation9], %s1135_s7, %s1135_s7, %s1136_s14  }
  0x2e   : > { %s263_s29 = scalar_lea.vmem [#allocation2], %s731_s18  ;;  %s270_s23 = sshll.u32 %s268_s3, 4  ;;  %s271_s23 = int_to_ptr.hbm [resolvable:$true] %s270_s23 }
  0x2f   : > { %s272_s10 = sshll.u32 %s263_s29, 4  ;;  %s260_s12 = scalar_lea.sflag [#allocation3], %s1240_s11  ;;  %s273_s10 = int_to_ptr.vmem [resolvable:$true] %s272_s10 }
  0x30   : > { %781 = dma.hbm_to_vmem [thread:$0]  (!%p1243_p12), %s271_s23, 128, %s273_s10, %s260_s12  }
  0x31   : > { %s302_s21 = scalar_lea.hbm %s1415_s2, %s1128_s25  ;;  %s299_s6 = scalar_lea.vmem [#allocation7], %s1240_s11 }
  0x32   : > { %s306_s5 = sshll.u32 %s299_s6, 4  ;;  %s304_s8 = sshll.u32 %s302_s21, 4  ;;  %s307_s5 = int_to_ptr.vmem [resolvable:$true] %s306_s5  ;;  %s305_s8 = int_to_ptr.hbm [resolvable:$true] %s304_s8 }
  0x33   : > { %787 = dma.hbm_to_vmem [thread:$0]  (!%p1243_p12), %s305_s8, 16, %s307_s5, %s1252_s20  }
  0x34   : > { %315 = sbr.rel (%p1272_p4) target bundleno = 593 (0x251), region = 36  ;;  %s1299_s1 = sand.u32 (!%p1272_p4), 1, %s1116_s22  }
  0x35   : > { %s734_s3 = sshll.u32 (!%p1272_p4), %s1299_s1, 3  ;;  %s318_s23 = scalar_lea.sflag (!%p1272_p4), [#allocation3], %s1299_s1 }
  0x36   : > { %s321_s26 = scalar_lea.vmem (!%p1272_p4), [#allocation2], %s734_s3 }
  0x39   : > { %1091 = dma.done.wait (%p1265_p2), %s318_s23, 128  }
  0x3a   : > { %1093 = vsyncadd (%p1265_p2), %s318_s23, 4294967168  ;;  %s327_s5 = sand.u32 1, %s1206_s27   ;;  %s330_s21 = scalar_lea.vmem [#allocation5], %s1299_s1 }
  0x3b   : > { %s328_s6 = scalar_lea.sflag [#allocation6], %s327_s5 }
  0x3c   : > { %1095 = dma.done.wait (%p1265_p2), %s328_s6, 32  }
  0x3d   : > { %1097 = vsyncadd (%p1265_p2), %s328_s6, 4294967264  ;;  %s339_s28 = scalar_lea.vmem [#allocation7], %s1299_s1 }
  0x3e   : > { %1099 = dma.done.wait (%p65_p13), [#allocation9], 256  }
  0x3f   : > { %1101 = vsyncadd (%p65_p13), [#allocation9], 4294967040  ;;  %vm396_vm0 = vcmask 261120   ;;  %v393_v0 = vld [vmem:[%s321_s26] sm:$0xff]  ;;  %v1137_v2 = vmov 32.0   ;;  %v756_v15 = vld [vmem:[#allocation8] sm:$0xff] }
  0x40   : > { %v397_v1 = vsel %vm396_vm0, %v393_v0, 0.0  ;;  %858 = vrcp.f32 %v1137_v2  ;;  %v757_v14 = vld [vmem:[#allocation8 + $0x8] sm:$0xff]  ;;  %s1328_s29 = sshll.u32 %s1299_s1, 2  ;;  %s1331_s8 = sshll.u32 %s1124_s24, 2  ;;  %vm468_vm5 = vcmask 257024  }
  0x41   : > { %398 = vadd.xlane.f32.xlu0 %v397_v1  ;;  %460 = vmatpush.bf16.msra.mxu0 %v757_v14  ;;  %v856_v25 = vld [vmem:[%s330_s21] ss:$0 sm:$0xff]  ;;  %s501_s11 = scalar_lea.hbm %s1417_s4, %s1331_s8  ;;  %s377_s13 = scalar_lea.vmem [#allocation10], %s1328_s29 }
  0x42   : > { %v857_v28 = vld [vmem:[%s339_s28] ss:$0 sm:$0xff]  ;;  %s503_s30 = sshll.u32 %s377_s13, 4  ;;  %s505_s15 = sshll.u32 %s501_s11, 4  ;;  %s504_s30 = int_to_ptr.vmem [resolvable:$true] %s503_s30  ;;  %s506_s15 = int_to_ptr.hbm [resolvable:$true] %s505_s15 }
  0x43   : > { %s1138_s16 = smov 96   ;;  %s480_s24 = scalar_lea.sflag [#allocation4], %s1299_s1 }
  0x44   : > { %s996_s17 = sshra.s32 %s506_s15, 4  ;;  %s1002_s14 = scalar_lea.hbm %s1417_s4, 8  ;;  %s997_s17 = int_to_ptr.hbm [resolvable:$true] %s996_s17 }
  0x45   : > { %461 = vmatpush.bf16.msra.mxu0 %v756_v15  ;;  %s998_s18 = scalar_lea.hbm %s997_s17, 4  ;;  %p1003_p12 = scmp.lt.s32.totalorder %s997_s17, %s1417_s4 }
  0x46   : > { %v859_v3 = vpop.eup %858  ;;  %p999_p6 = scmp.ne.s32.totalorder %s997_s17, %s998_s18  ;;  %p1004_p13 = scmp.lt.s32.totalorder %s1002_s14, %s998_s18 }
  0x47   : > { %v401_v4 = vmul.f32 32.0, %v859_v3  ;;  %vm405_vm1 = vweird.f32 %v859_v3 }
  0x48   : > { %p1000_p7 = pnand %p999_p6, %p1223_p8  ;;  %p1005_p0 = por %p1004_p13, %p1003_p12 }
  0x49   : > { %v402_v5 = vsub.f32 1.0, %v401_v4 }
  0x4a   : > { %p1001_p11 = pneg %p1000_p7 }
  0x4b   : > { %v403_v6 = vmul.f32 %v859_v3, %v402_v5 }
  0x4c   : > { %p1006_p1 = pnand %p1005_p0, %p1001_p11 }
  0x4d   : > { %v404_v7 = vadd.f32 %v859_v3, %v403_v6 }
  0x4f   : > { %v406_v8 = vsel %vm405_vm1, %v859_v3, %v404_v7 }
  0xb4   : > { %v399_v9 = vpop.xlane.xlu0 %398 }
  0xb5   : > { %v407_v10 = vmul.f32 %v406_v8, %v399_v9 }
  0xb7   : > { %v408_v11 = vsub.f32 %v393_v0, %v407_v10 }
  0xb9   : > { %v409_v12 = vmul.f32 %v408_v11, %v408_v11 }
  0xbb   : > { %v410_v13 = vsel %vm396_vm0, %v409_v12, 0.0 }
  0xbc   : > { %411 = vadd.xlane.f32.xlu0 %v410_v13 }
 0x12f   : > { %v412_v16 = vpop.xlane.xlu0 %411 }
 0x130   : > { %v413_v17 = vmul.f32 %v412_v16, %v406_v8 }
 0x132   : > { %v414_v18 = vadd.f32 1e-05, %v413_v17 }
 0x134   : > { %860 = vrsqrt.f32 %v414_v18  ;;  %vm421_vm3 = vweird.f32 %v414_v18 }
 0x13a   : > { %v861_v19 = vpop.eup %860 }
 0x13b   : > { %v416_v20 = vmul.f32 %v861_v19, %v414_v18  ;;  %vm422_vm2 = vweird.f32 %v861_v19 }
 0x13c   : > { %vm423_vm4 = vmor %vm421_vm3, %vm422_vm2 }
 0x13d   : > { %v417_v21 = vmul.f32 %v861_v19, %v416_v20 }
 0x13f   : > { %v418_v22 = vmul.f32 0.5, %v417_v21 }
 0x141   : > { %v419_v23 = vsub.f32 1.5, %v418_v22 }
 0x143   : > { %v420_v24 = vmul.f32 %v861_v19, %v419_v23 }
 0x145   : > { %v424_v26 = vsel %vm423_vm4, %v861_v19, %v420_v24 }
 0x146   : > { %v425_v27 = vmul.f32 %v424_v26, %v408_v11 }
 0x148   : > { %v429_v29 = vmul.f32 %v856_v25, %v425_v27 }
 0x14a   : > { %v433_v30 = vadd.f32 %v857_v28, %v429_v29 }
 0x14c   : > { %v434_v31 = vpack.c.bf16 %v433_v30, %v433_v30 }
 0x14e   : > { %747 = vmatmul.msk.bf16.vlgmr.msra.gmra.mxu0 %vm396_vm0, %v434_v31 }
 0x1cb   : > { %v463_v32 = vpop.f32.mrf.mxu0 }
 0x1cc   : > { %v467_v33 = vpack.c.bf16 %v463_v32, %v463_v32 }
 0x1ce   : > { %471 = vrot.lane.b32.xlu1 %v467_v33, %s1138_s16  ;;  %469 = vst.msk [vmem:[%s377_s13] sm:$0xf] %vm468_vm5, %v467_v33 }
 0x1cf   : > { %1009 = shalt.err (!%p1006_p1)
}
 0x1d0   : > { %768 = dma.vmem_to_hbm [thread:$0]  (%p1223_p8), %s504_s30, 64, %s506_s15, %s480_s24  }
 0x1d1   : > { %s1139_s1 = smov 64   ;;  %s1450_s6 = sld [smem:[#allocation28_spill]] }
 0x1d2   : > { %s384_s28 = scalar_lea.vmem [#allocation11], %s1328_s29  ;;  %s1451_s16 = sld [smem:[#allocation29_spill]] }
 0x1d3   : > { %v465_v34 = vpop.f32.mrf.mxu0  ;;  %s518_s9 = sshll.u32 %s384_s28, 4  ;;  %s1362_s15 = scalar_lea.sflag [#allocation12], %s327_s5  ;;  %s519_s9 = int_to_ptr.vmem [resolvable:$true] %s518_s9 }
 0x1d6   : > { %475 = vrot.lane.b32.xlu1 %v467_v33, %s1139_s1 }
 0x1d7   : > { %s516_s21 = scalar_lea.hbm %s1450_s6, %s1331_s8  ;;  %s1030_s7 = scalar_lea.hbm %s1450_s6, 8 }
 0x1d8   : > { %s520_s10 = sshll.u32 %s516_s21, 4  ;;  %s531_s30 = scalar_lea.hbm %s1451_s16, %s1331_s8  ;;  %s521_s10 = int_to_ptr.hbm [resolvable:$true] %s520_s10 }
 0x1d9   : > { %s1024_s24 = sshra.s32 %s521_s10, 4  ;;  %s1025_s24 = int_to_ptr.hbm [resolvable:$true] %s1024_s24 }
 0x1da   : > { %s1026_s17 = scalar_lea.hbm %s1025_s24, 4  ;;  %p1031_p3 = scmp.lt.s32.totalorder %s1025_s24, %s1450_s6 }
 0x1db   : > { %p1027_p2 = scmp.ne.s32.totalorder %s1025_s24, %s1026_s17  ;;  %p1032_p6 = scmp.lt.s32.totalorder %s1030_s7, %s1026_s17 }
 0x1dd   : > { %p1028_p4 = pnand %p1027_p2, %p1223_p8  ;;  %p1033_p7 = por %p1032_p6, %p1031_p3 }
 0x1df   : > { %p1029_p5 = pneg %p1028_p4 }
 0x1e1   : > { %p1034_p11 = pnand %p1033_p7, %p1029_p5 }
 0x240   : > { %v472_v35 = vpop.permute.xlu1 %471 }
 0x241   : > { %474 = vst.msk [vmem:[%s384_s28] sm:$0xf] %vm468_vm5, %v472_v35 }
 0x242   : > { %1037 = shalt.err (!%p1034_p11)
}
 0x243   : > { %769 = dma.vmem_to_hbm [thread:$0]  (%p1223_p8), %s519_s9, 64, %s521_s10, %s1362_s15  }
 0x244   : > { %s391_s27 = scalar_lea.vmem [#allocation13], %s1328_s29  ;;  %s535_s8 = sshll.u32 %s531_s30, 4  ;;  %s536_s8 = int_to_ptr.hbm [resolvable:$true] %s535_s8 }
 0x245   : > { %s533_s5 = sshll.u32 %s391_s27, 4  ;;  %s1052_s3 = sshra.s32 %s536_s8, 4  ;;  %s534_s5 = int_to_ptr.vmem [resolvable:$true] %s533_s5  ;;  %s1053_s3 = int_to_ptr.hbm [resolvable:$true] %s1052_s3 }
 0x246   : > { %s1054_s1 = scalar_lea.hbm %s1053_s3, 4  ;;  %s1058_s21 = scalar_lea.hbm %s1451_s16, 8 }
 0x247   : > { %p1055_p12 = scmp.ne.s32.totalorder %s1053_s3, %s1054_s1  ;;  %p1059_p1 = scmp.lt.s32.totalorder %s1053_s3, %s1451_s16 }
 0x248   : > { %v476_v36 = vpop.permute.xlu1 %475  ;;  %p1060_p2 = scmp.lt.s32.totalorder %s1058_s21, %s1054_s1 }
 0x249   : > { %478 = vst.msk [vmem:[%s391_s27] sm:$0xf] %vm468_vm5, %v476_v36  ;;  %p1056_p13 = pnand %p1055_p12, %p1223_p8 }
 0x24a   : > { %p1061_p4 = por %p1060_p2, %p1059_p1 }
 0x24b   : > { %p1057_p0 = pneg %p1056_p13 }
 0x24d   : > { %p1062_p5 = pnand %p1061_p4, %p1057_p0 }
 0x24f   : > { %1065 = shalt.err (!%p1062_p5)
}
 0x250   : > { %770 = dma.vmem_to_hbm [thread:$0]  (%p1223_p8), %s534_s5, 64, %s536_s8, %s1362_s15  }
 0x251 PF: > { %s1452_s9 = sld [smem:[#allocation19_spill]]  ;;  %p789_p3 = pnand %p730_p10, %p1230_p9 }
 0x252   : > { %s1454_s11 = sld [smem:[#allocation21_spill]] }
 0x253   : > { %p790_p6 = pneg %p789_p3 }
 0x257   : > { %s547_s13 = sand.u32 1, %s1452_s9  }
 0x258   : > { %s548_s30 = scalar_lea.sflag [#allocation4], %s547_s13 }
 0x259   : > { %1103 = dma.done.wait (%p790_p6), %s548_s30, 64  }
 0x25a   : > { %1105 = vsyncadd (%p790_p6), %s548_s30, 4294967232  ;;  %s1455_s24 = sadd.s32 4294967294, %s1454_s11  }
 0x25b   : > { %s557_s17 = sand.u32 1, %s1455_s24  }
 0x25c   : > { %s558_s18 = scalar_lea.sflag [#allocation12], %s557_s17 }
 0x25d   : > { %1107 = dma.done.wait (%p790_p6), %s558_s18, 128  }
 0x25e   : > { %1109 = vsyncadd (%p790_p6), %s558_s18, 4294967168  ;;  %s30_s26 = sadd.s32 1, %s1454_s11   ;;  %s1456_s20 = sld [smem:[#allocation20_spill]] }
 0x25f   : > { %p27_p8 = scmp.ge.s32.totalorder %s30_s26, 4   ;;  %s1457_s23 = sld [smem:[#allocation25_spill]] }
 0x260   : > { %s1458_s15 = sld [smem:[#allocation22_spill]]  ;;  %s1459_s21 = smov %s1116_s22 }
 0x261   : > { %s1461_s24 = smov %s1128_s25 }
 0x262   :  { %29 = sbr.rel (!%p27_p8) target bundleno = 16 (0x10), region = 141 }
 0x264   : > { %s1460_s22 = smov %s1456_s20 }
 0x266   : > { %s1462_s25 = smov %s1458_s15 }
 0x267   :  { %574 = vsyncpa [#allocation3], 1 }
 0x268   :  { %576 = vsyncpa [#allocation3 + $0x1], 1 }
 0x269   :  { %577 = vsyncpa [#allocation6], 1 }
 0x26a   :  { %579 = vsyncpa [#allocation6 + $0x1], 1 }
 0x26b   :  { %580 = vsyncpa [#allocation9], 1 }
 0x26c   :  { %581 = vsyncpa [#allocation4], 1 }
 0x26d   :  { %583 = vsyncpa [#allocation4 + $0x1], 1 }
 0x26e   :  { %584 = vsyncpa [#allocation12], 1 }
 0x26f   :  { %586 = vsyncpa [#allocation12 + $0x1], 1 }

</bundles_post_ra>
